<compile_context>
chip_gen: v6e
topology: v6e:2x2x1
jax: 0.10.0
libtpu: 0.0.40
codegen_flags: <defaults>
</compile_context>

<pallas_src>
import functools
import math

import jax
import jax.numpy as jnp
from jax.experimental import pallas as pl
from jax.experimental.pallas import tpu as pltpu

BN_EPS = 1e-5
LANE = 128
SUBLANE = 8
INV_SQRT2 = 1.0 / math.sqrt(2.0)


def _round_up(n, m):
    return ((n + m - 1) // m) * m


def _pick_tile(padded_dim, pref):
    """Largest multiple of 128 <= pref that divides padded_dim (padded_dim % 128 == 0)."""
    t = max(LANE, (min(pref, padded_dim) // LANE) * LANE)
    while padded_dim % t:
        t -= LANE
    return t


def _physical_vmem_bytes():
    try:
        return int(pltpu.get_tpu_info().vmem_capacity_bytes)
    except Exception:
        return 64 * 1024 * 1024  # conservative fallback (v7x per-core VMEM)


def _footprint_bytes(B_p, Din_p, tn, tk, residual, resident_x, single_k):
    """Conservative f32 VMEM footprint of one grid step (2 buffers per pipelined stream)."""
    elems = 0
    if resident_x:
        elems += 2 * B_p * Din_p            # whole padded x resident
    else:
        elems += 2 * B_p * tk               # x K-slice stream
        if residual:
            elems += 2 * B_p * tn           # second x stream for the residual add
    elems += 2 * tk * tn                    # W tile stream
    elems += 2 * 2 * SUBLANE * tn           # gamma/beta (sublane-padded)
    elems += 2 * B_p * tn                   # output tile
    if not single_k:
        elems += B_p * tn                   # f32 accumulator scratch
    return 4 * elems


def _plan(B_p, Din_p, Dout_p, residual, tn_pref, tk_pref, budget, force_resident):
    tn = _pick_tile(Dout_p, tn_pref)
    # Megacore (v7x): make sure the "parallel" Dout axis has >= 2 tiles when possible.
    if Dout_p // tn < 2 <= Dout_p // LANE:
        tn = _pick_tile(Dout_p, Dout_p // 2)
    tk = _pick_tile(Din_p, tk_pref)

    def fp(tn_, tk_, res):
        return _footprint_bytes(B_p, Din_p, tn_, tk_, residual, res, tk_ == Din_p)

    if force_resident is None:
        resident_x = fp(tn, tk, True) <= budget
    else:
        resident_x = bool(force_resident)

    # Over budget: shrink the K tile first, then the Dout tile.
    while fp(tn, tk, resident_x) > budget and tk > LANE:
        tk = _pick_tile(Din_p, tk - LANE)
    while fp(tn, tk, resident_x) > budget and tn > LANE:
        tn = _pick_tile(Dout_p, tn - LANE)

    single_k = (tk == Din_p)
    return tn, tk, resident_x, single_k, fp(tn, tk, resident_x)


def fclayer_kernel(x_ref, w_ref, gamma_ref, beta_ref, *rest,
                   residual, resident_x, single_k, tk, tn, inv_b):
    """Grid = (Dout tiles [parallel][, K tiles [arbitrary, reduction]]).

    x_ref:     (B_p, Din_p) if resident_x else (B_p, tk)
    w_ref:     (tk, tn)      contiguous block-major weight tile (Din, Dout layout)
    gamma_ref: (1, tn)
    beta_ref:  (1, tn)
    [xres_ref: (B_p, tn)]    only when residual and x is streamed
    o_ref:     (B_p, tn)
    [acc_ref:  (B_p, tn) f32 scratch]  only when the K axis has > 1 step
    """
    idx = 0
    xres_ref = None
    if residual and not resident_x:
        xres_ref = rest[idx]
        idx += 1
    o_ref = rest[idx]
    idx += 1
    acc_ref = None if single_k else rest[idx]

    j = pl.program_id(0)

    def epilogue(y):
        # One-pass training-mode BatchNorm1d stats over the (zero-padded) batch; zero rows
        # contribute nothing to the sums, so dividing by the real batch size is exact.
        s1 = jnp.sum(y, axis=0, keepdims=True)
        s2 = jnp.sum(y * y, axis=0, keepdims=True)
        mean = s1 * inv_b
        var = jnp.maximum(s2 * inv_b - mean * mean, 0.0)
        # Fold gamma * rsqrt(var + eps) into one per-feature scale (rsqrt on EUP).
        scale = gamma_ref[...] * jax.lax.rsqrt(var + BN_EPS)
        shift = beta_ref[...] - mean * scale
        out = jnp.maximum(y * scale + shift, 0.0)
        if residual:
            if resident_x:
                xres = x_ref[:, pl.ds(pl.multiple_of(j * tn, LANE), tn)]
            else:
                xres = xres_ref[...]
            out = (out + xres) * INV_SQRT2
        o_ref[...] = out.astype(o_ref.dtype)

    if single_k:
        # Fast path: no accumulator scratch, no init/finalize gating.
        y = jnp.dot(x_ref[...], w_ref[...], preferred_element_type=jnp.float32)
        epilogue(y)
    else:
        k = pl.program_id(1)

        @pl.when(k == 0)
        def _():
            acc_ref[...] = jnp.zeros_like(acc_ref)

        if resident_x:
            xk = x_ref[:, pl.ds(pl.multiple_of(k * tk, LANE), tk)]
        else:
            xk = x_ref[...]
        # MXU: weight already (Din, Dout) -> feeds the systolic array directly, no transpose.
        acc_ref[...] += jnp.dot(xk, w_ref[...], preferred_element_type=jnp.float32)

        @pl.when(k == pl.num_programs(1) - 1)
        def _():
            epilogue(acc_ref[...])


def fclayer_prepare(w, b, gamma, beta, *, batch, tn_pref=512, tk_pref=1024,
                    force_resident_x=None):
    """One-time (init-time) layout prep + tile plan.  Do NOT call per forward step.

    w: (Dout, Din) PyTorch Linear layout; b/gamma/beta: (Dout,).
    The Linear bias `b` is accepted for API parity but is mathematically cancelled by
    training-mode BatchNorm's mean subtraction, so it is never sent to the kernel.
    """
    del b  # exactly cancelled by BN mean subtraction (training mode)
    Dout, Din = w.shape
    residual = (Din == Dout)

    B_p = _round_up(max(int(batch), 1), SUBLANE)   # full sublanes; BN divides by real batch
    Din_p = _round_up(Din, LANE)
    Dout_p = _round_up(Dout, LANE)

    phys = _physical_vmem_bytes()
    budget = (phys * 3) // 4                       # leave double-buffer / compiler headroom
    tn, tk, resident_x, single_k, fp = _plan(
        B_p, Din_p, Dout_p, residual, tn_pref, tk_pref, budget, force_resident_x)
    vmem_limit = int(min(phys * 9 // 10, fp + fp // 2 + (8 << 20)))

    # Weight: transpose to (Din, Dout), zero-pad to lane multiples, then block-major
    # (n_j, n_k, tk, tn) so every kernel tile is a single contiguous HBM DMA.
    wT_p = jnp.pad(w.T, ((0, Din_p - Din), (0, Dout_p - Dout)))
    w_blk = wT_p.reshape(Din_p // tk, tk, Dout_p // tn, tn).transpose(2, 0, 1, 3)
    gamma_p = jnp.pad(gamma, (0, Dout_p - Dout)).reshape(1, Dout_p)
    beta_p = jnp.pad(beta, (0, Dout_p - Dout)).reshape(1, Dout_p)

    return dict(batch=int(batch), din=Din, dout=Dout,
                b_p=B_p, din_p=Din_p, dout_p=Dout_p,
                tn=tn, tk=tk, residual=residual, resident_x=resident_x,
                single_k=single_k, vmem_limit=vmem_limit,
                w=w_blk, gamma=gamma_p, beta=beta_p)


def fclayer_forward(x, params):
    """Hot-path FCLayer forward.  x: (B, Din) f32; params from fclayer_prepare."""
    B, Din = x.shape
    assert Din == params["din"] and B == params["batch"]
    B_p, Din_p, Dout_p = params["b_p"], params["din_p"], params["dout_p"]
    tn, tk = params["tn"], params["tk"]
    residual = params["residual"]
    resident_x = params["resident_x"]
    single_k = params["single_k"]

    x_p = x
    if (B_p, Din_p) != (B, Din):
        x_p = jnp.pad(x, ((0, B_p - B), (0, Din_p - Din)))

    n_j = Dout_p // tn

    if single_k:
        grid = (n_j,)
        semantics = ("parallel",)
        x_im = lambda j: (0, 0)
        w_im = lambda j: (j, 0, 0, 0)
        col_im = lambda j: (0, j)
        x_block = (B_p, Din_p)
    else:
        grid = (n_j, Din_p // tk)
        semantics = ("parallel", "arbitrary")
        x_im = (lambda j, k: (0, 0)) if resident_x else (lambda j, k: (0, k))
        w_im = lambda j, k: (j, k, 0, 0)
        col_im = lambda j, k: (0, j)
        x_block = (B_p, Din_p) if resident_x else (B_p, tk)

    in_specs = [
        pl.BlockSpec(x_block, x_im),                     # x (resident or K-sliced)
        pl.BlockSpec((None, None, tk, tn), w_im),        # contiguous block-major W tile
        pl.BlockSpec((1, tn), col_im),                   # gamma
        pl.BlockSpec((1, tn), col_im),                   # beta
    ]
    args = [x_p, params["w"], params["gamma"], params["beta"]]
    if residual and not resident_x:
        in_specs.append(pl.BlockSpec((B_p, tn), col_im))  # Dout-aligned x slice for residual
        args.append(x_p)

    scratch = [] if single_k else [pltpu.VMEM((B_p, tn), jnp.float32)]

    kernel = functools.partial(
        fclayer_kernel, residual=residual, resident_x=resident_x,
        single_k=single_k, tk=tk, tn=tn, inv_b=1.0 / B)

    out_p = pl.pallas_call(
        kernel,
        out_shape=jax.ShapeDtypeStruct((B_p, Dout_p), jnp.float32),
        grid_spec=pltpu.PrefetchScalarGridSpec(
            num_scalar_prefetch=0,
            grid=grid,
            in_specs=in_specs,
            out_specs=pl.BlockSpec((B_p, tn), col_im),
            scratch_shapes=scratch,
        ),
        compiler_params=pltpu.CompilerParams(
            dimension_semantics=semantics,
            vmem_limit_bytes=params["vmem_limit"],
        ),
    )(*args)

    return out_p[:B, :params["dout"]]


if __name__ == "__main__":
    key = jax.random.PRNGKey(0)

    def reference(x, w, b, gamma, beta):
        # Pure-JAX FCLayer reference (training-mode BatchNorm semantics, bias included).
        y = jnp.dot(x, w.T, precision=jax.lax.Precision.HIGHEST) + b
        mean = jnp.mean(y, axis=0, keepdims=True)
        var = jnp.mean((y - mean) ** 2, axis=0, keepdims=True)
        out = jnp.maximum((y - mean) / jnp.sqrt(var + BN_EPS) * gamma + beta, 0.0)
        if x.shape[1] == w.shape[0]:
            out = (out + x) / math.sqrt(2.0)
        return out

    # Cases exercise: residual/non-residual, single-K fast path, multi-K accumulator,
    # resident-x vs streamed-x, and a batch that is not a multiple of 8.
    cases = [
        dict(b=8,  din=32,  dout=32),                                          # residual, single-K, resident x
        dict(b=8,  din=32,  dout=48),                                          # no residual, single-K
        dict(b=12, din=256, dout=256, tk_pref=128, tn_pref=128),               # residual, multi-K, resident x, B%8!=0
        dict(b=16, din=384, dout=256, tk_pref=128, tn_pref=128, force=False),  # multi-K, streamed x
        dict(b=12, din=256, dout=256, tk_pref=128, tn_pref=128, force=False),  # residual, multi-K, streamed x
    ]
    for c in cases:
        kx, kw, kb, kg, kbt, key = jax.random.split(key, 6)
        B, Din, Dout = c["b"], c["din"], c["dout"]
        x = jax.random.normal(kx, (B, Din), dtype=jnp.float32)
        bound = 1.0 / math.sqrt(Din)
        w = jax.random.uniform(kw, (Dout, Din),
                               minval=-bound, maxval=bound, dtype=jnp.float32)
        b = jax.random.uniform(kb, (Dout,),
                               minval=-bound, maxval=bound, dtype=jnp.float32)
        gamma = 1.0 + 0.1 * jax.random.normal(kg, (Dout,), dtype=jnp.float32)
        beta = 0.1 * jax.random.normal(kbt, (Dout,), dtype=jnp.float32)

        # Init-time weight/layout prep (hoisted out of the per-step hot path).
        params = fclayer_prepare(
            w, b, gamma, beta, batch=B,
            tn_pref=c.get("tn_pref", 512), tk_pref=c.get("tk_pref", 1024),
            force_resident_x=c.get("force", None))

        out = fclayer_forward(x, params)
        jax.block_until_ready(out)

        ref = reference(x, w, b, gamma, beta)
        assert out.shape == ref.shape, f"shape mismatch for case {c}"
        assert jnp.allclose(out, ref, atol=3e-5, rtol=3e-5), \
            f"mismatch vs reference for case {c}"

    print("KERNEL_OK")
</pallas_src>

<mosaic_0001>
module attributes {stable_mosaic.version = 11 : i64} {
  func.func @fclayer_kernel(%arg0: i32, %arg1: memref<8x128xf32, #tpu.memory_space<vmem>>, %arg2: memref<1x1x128x128xf32, #tpu.memory_space<vmem>>, %arg3: memref<1x128xf32, #tpu.memory_space<vmem>>, %arg4: memref<1x128xf32, #tpu.memory_space<vmem>>, %arg5: memref<8x128xf32, #tpu.memory_space<vmem>>) attributes {dimension_semantics = [#tpu.dimension_semantics<parallel>], iteration_bounds = array<i64: 1>, scalar_prefetch = 0 : i64, scratch_operands = 0 : i64, tpu.core_type = #tpu.core_type<tc>, window_params = [{pipeline_mode = #tpu.pipeline_mode<synchronous>, transform_indices = @transform_0, window_bounds = array<i64: 8, 128>}, {transform_indices = @transform_1, window_bounds = array<i64: 1, 1, 128, 128>}, {transform_indices = @transform_2, window_bounds = array<i64: 1, 128>}, {transform_indices = @transform_3, window_bounds = array<i64: 1, 128>}, {transform_indices = @transform_4, window_bounds = array<i64: 8, 128>}]} {
    %c0 = arith.constant 0 : index
    %c0_0 = arith.constant 0 : index
    %0 = vector.load %arg1[%c0, %c0_0] : memref<8x128xf32, #tpu.memory_space<vmem>>, vector<8x128xf32>
    %c0_1 = arith.constant 0 : index
    %c0_2 = arith.constant 0 : index
    %c0_3 = arith.constant 0 : index
    %c0_4 = arith.constant 0 : index
    %1 = vector.load %arg2[%c0_1, %c0_2, %c0_3, %c0_4] : memref<1x1x128x128xf32, #tpu.memory_space<vmem>>, vector<1x1x128x128xf32>
    %2 = vector.shape_cast %1 : vector<1x1x128x128xf32> to vector<128x128xf32>
    %cst = arith.constant dense<0.000000e+00> : vector<8x128xf32>
    %3 = tpu.matmul %0, %2, %cst {dimension_numbers = #tpu.dot_dimension_numbers<[1], [0], [0], [1], [0, 0, 1, 1], [], []>} : vector<8x128xf32>, vector<128x128xf32>, vector<8x128xf32> -> vector<8x128xf32>
    %cst_5 = arith.constant dense<0.000000e+00> : vector<128xf32>
    %4 = vector.multi_reduction <add>, %3, %cst_5 [0] : vector<8x128xf32> to vector<128xf32>
    %5 = vector.shape_cast %4 : vector<128xf32> to vector<1x128xf32>
    %6 = arith.mulf %3, %3 : vector<8x128xf32>
    %cst_6 = arith.constant dense<0.000000e+00> : vector<128xf32>
    %7 = vector.multi_reduction <add>, %6, %cst_6 [0] : vector<8x128xf32> to vector<128xf32>
    %8 = vector.shape_cast %7 : vector<128xf32> to vector<1x128xf32>
    %cst_7 = arith.constant 1.250000e-01 : f32
    %9 = vector.broadcast %cst_7 : f32 to vector<1x128xf32>
    %10 = arith.mulf %5, %9 : vector<1x128xf32>
    %cst_8 = arith.constant 1.250000e-01 : f32
    %11 = vector.broadcast %cst_8 : f32 to vector<1x128xf32>
    %12 = arith.mulf %8, %11 : vector<1x128xf32>
    %13 = arith.mulf %10, %10 : vector<1x128xf32>
    %14 = arith.subf %12, %13 : vector<1x128xf32>
    %cst_9 = arith.constant 0.000000e+00 : f32
    %15 = vector.broadcast %cst_9 : f32 to vector<1x128xf32>
    %16 = arith.maximumf %14, %15 : vector<1x128xf32>
    %c0_10 = arith.constant 0 : index
    %c0_11 = arith.constant 0 : index
    %17 = vector.load %arg3[%c0_10, %c0_11] : memref<1x128xf32, #tpu.memory_space<vmem>>, vector<1x128xf32>
    %cst_12 = arith.constant 9.99999974E-6 : f32
    %18 = vector.broadcast %cst_12 : f32 to vector<1x128xf32>
    %19 = arith.addf %16, %18 : vector<1x128xf32>
    %20 = math.rsqrt %19 : vector<1x128xf32>
    %21 = arith.mulf %17, %20 : vector<1x128xf32>
    %c0_13 = arith.constant 0 : index
    %c0_14 = arith.constant 0 : index
    %22 = vector.load %arg4[%c0_13, %c0_14] : memref<1x128xf32, #tpu.memory_space<vmem>>, vector<1x128xf32>
    %23 = arith.mulf %10, %21 : vector<1x128xf32>
    %24 = arith.subf %22, %23 : vector<1x128xf32>
    %25 = vector.broadcast %21 : vector<1x128xf32> to vector<8x128xf32>
    %26 = arith.mulf %3, %25 : vector<8x128xf32>
    %27 = vector.broadcast %24 : vector<1x128xf32> to vector<8x128xf32>
    %28 = arith.addf %26, %27 : vector<8x128xf32>
    %cst_15 = arith.constant 0.000000e+00 : f32
    %29 = vector.broadcast %cst_15 : f32 to vector<8x128xf32>
    %30 = arith.maximumf %28, %29 : vector<8x128xf32>
    %c128_i32 = arith.constant 128 : i32
    %31 = arith.muli %arg0, %c128_i32 : i32
    %32 = tpu.assume_multiple %31, 128 : i32
    %c0_16 = arith.constant 0 : index
    %33 = arith.index_cast %32 : i32 to index
    %34 = vector.load %arg1[%c0_16, %33] : memref<8x128xf32, #tpu.memory_space<vmem>>, vector<8x128xf32>
    %35 = arith.addf %30, %34 : vector<8x128xf32>
    %cst_17 = arith.constant 0.707106769 : f32
    %36 = vector.broadcast %cst_17 : f32 to vector<8x128xf32>
    %37 = arith.mulf %35, %36 : vector<8x128xf32>
    %c0_18 = arith.constant 0 : index
    %c0_19 = arith.constant 0 : index
    %38 = vector.load %arg5[%c0_18, %c0_19] : memref<8x128xf32, #tpu.memory_space<vmem>>, vector<8x128xf32>
    tpu.vector_store %arg5[%c0_18, %c0_19], %37 {strides = array<i32>} : memref<8x128xf32, #tpu.memory_space<vmem>>, vector<8x128xf32>,
    return
  }
  func.func @transform_0(%arg0: i32) -> (i32, i32) {
    %c0_i32 = arith.constant 0 : i32
    %c0_i32_0 = arith.constant 0 : i32
    %c0_i32_1 = arith.constant 0 : i32
    return %c0_i32, %c0_i32_0 : i32, i32
  }
  func.func @transform_1(%arg0: i32) -> (i32, i32, i32, i32) {
    %c0_i32 = arith.constant 0 : i32
    %c0_i32_0 = arith.constant 0 : i32
    %c0_i32_1 = arith.constant 0 : i32
    %c0_i32_2 = arith.constant 0 : i32
    return %arg0, %c0_i32, %c0_i32_0, %c0_i32_1 : i32, i32, i32, i32
  }
  func.func @transform_2(%arg0: i32) -> (i32, i32) {
    %c0_i32 = arith.constant 0 : i32
    %c0_i32_0 = arith.constant 0 : i32
    return %c0_i32, %arg0 : i32, i32
  }
  func.func @transform_3(%arg0: i32) -> (i32, i32) {
    %c0_i32 = arith.constant 0 : i32
    %c0_i32_0 = arith.constant 0 : i32
    return %c0_i32, %arg0 : i32, i32
  }
  func.func @transform_4(%arg0: i32) -> (i32, i32) {
    %c0_i32 = arith.constant 0 : i32
    %c0_i32_0 = arith.constant 0 : i32
    return %c0_i32, %arg0 : i32, i32
  }
}

</mosaic_0001>

<bundles_post_ra>
// kernel: tpu_custom_call.1
= control target key start
LH: loop header
LB: loop body
LE: loop exit
PB: predicated region body
PF: predicated region fallthrough
CT: control target
= control target key end

     0   :  { %9 = vsyncpa [#allocation3], 0  ;;  %s370_s0 = inlined_call_operand.hbm [shape: f32[8,128], index: 0, kind: input, shape index: {}]   ;;  %s371_s1 = inlined_call_operand.hbm [shape: f32[1,1,128,128], index: 1, kind: input, shape index: {}]   ;;  %s372_s2 = inlined_call_operand.vmem [shape: f32[1,128], index: 2, kind: input, shape index: {}]   ;;  %s373_s3 = inlined_call_operand.vmem [shape: f32[1,128], index: 3, kind: input, shape index: {}]   ;;  %s374_s4 = inlined_call_operand.hbm [shape: f32[8,128], index: 4, kind: output, shape index: {}]  }
   0x1   :  { %10 = vsyncpa [#allocation6], 0 }
   0x2   :  { %11 = vsyncpa [#allocation4], 0  ;;  %s323_s15 = smov [#allocation2]   ;;  %s324_s17 = smov [#allocation5]  }
   0x3   :  { %s18_s16 = sshll.u32 %s323_s15, 4  ;;  %s27_s18 = sshll.u32 %s324_s17, 4  ;;  %s19_s16 = int_to_ptr.vmem [resolvable:$true] %s18_s16  ;;  %s28_s18 = int_to_ptr.vmem [resolvable:$true] %s27_s18 }
   0x4   :  { %s265_s19 = scalar_lea.vmem %s19_s16, 128  ;;  %p270_p1 = scmp.lt.s32.totalorder %s19_s16, %s19_s16 }
   0x5   :  { %p266_p0 = scmp.ne.s32.totalorder %s19_s16, %s265_s19  ;;  %p271_p2 = scmp.lt.s32.totalorder %s265_s19, %s265_s19 }
   0x7   :  { %p272_p3 = por %p271_p2, %p270_p1 }
   0x9   :  { %p273_p4 = pnand %p272_p3, %p266_p0 }
   0xb   :  { %276 = shalt.err (!%p273_p4)
}
   0xc   :  { %21 = dma.hbm_to_vmem [thread:$0]  %s370_s0, 128, %s19_s16, [#allocation3]  }
   0xd   :  { %s285_s22 = scalar_lea.vmem %s28_s18, 2048  ;;  %p290_p6 = scmp.lt.s32.totalorder %s28_s18, %s28_s18 }
   0xe   :  { %p286_p5 = scmp.ne.s32.totalorder %s28_s18, %s285_s22  ;;  %p291_p7 = scmp.lt.s32.totalorder %s285_s22, %s285_s22 }
  0x10   :  { %p292_p8 = por %p291_p7, %p290_p6 }
  0x12   :  { %p293_p9 = pnand %p292_p8, %p286_p5 }
  0x14   :  { %296 = shalt.err (!%p293_p9)
}
  0x15   :  { %s325_s23 = smov 128   ;;  %s326_s24 = smov 8  }
  0x16   :  { %33 = dma.hbm_to_vmem [thread:$0]  %s371_s1, 2048, %s28_s18, [#allocation6], %s325_s23, %s325_s23, %s326_s24  }
  0x17   :  { %317 = dma.done.wait [#allocation3], 128  }
  0x18   :  { %318 = vsyncadd [#allocation3], 4294967168 }
  0x19   :  { %319 = dma.done.wait [#allocation6], 2048  }
  0x1a   :  { %320 = vsyncadd [#allocation6], 4294965248  ;;  %v327_v0 = vmov 0.0   ;;  %vm328_vm0 = vmmov 0   ;;  %v60_v1 = vld [vmem:[#allocation5 + $0x78] sm:$0xff]  ;;  %v59_v2 = vld [vmem:[#allocation5 + $0x70] sm:$0xff]  ;;  %v157_v39 = vlaneseq }
  0x1b   :  { %213 = vmatprep.subr.mxu0 %v327_v0  ;;  %245 = vmatprep.mubr.msk.f32.mxu0 %vm328_vm0, %v327_v0  ;;  %v58_v3 = vld [vmem:[#allocation5 + $0x68] sm:$0xff]  ;;  %v57_v4 = vld [vmem:[#allocation5 + $0x60] sm:$0xff]  ;;  %v56_v5 = vld [vmem:[#allocation5 + $0x58] sm:$0xff]  ;;  %s329_s29 = smov [#allocation7]  }
  0x1c   :  { %214 = vmatpush3.msra.mxu0 %v60_v1  ;;  %v55_v6 = vld [vmem:[#allocation5 + $0x50] sm:$0xff]  ;;  %v54_v7 = vld [vmem:[#allocation5 + $0x48] sm:$0xff]  ;;  %v53_v8 = vld [vmem:[#allocation5 + $0x40] sm:$0xff]  ;;  %v158_v40 = vshrl.u32 %v157_v39, 7  ;;  %s185_s30 = sshll.u32 %s329_s29, 4  ;;  %s186_s30 = int_to_ptr.vmem [resolvable:$true] %s185_s30 }
  0x1d   :  { %215 = vmatprep.subr.mxu0 %v327_v0  ;;  %v52_v9 = vld [vmem:[#allocation5 + $0x38] sm:$0xff]  ;;  %v51_v10 = vld [vmem:[#allocation5 + $0x30] sm:$0xff]  ;;  %v50_v11 = vld [vmem:[#allocation5 + $0x28] sm:$0xff]  ;;  %p302_p11 = scmp.lt.s32.totalorder %s186_s30, %s186_s30 }
  0x1e   :  { %216 = vmatpush3.msra.mxu0 %v59_v2  ;;  %v49_v12 = vld [vmem:[#allocation5 + $0x20] sm:$0xff]  ;;  %v48_v13 = vld [vmem:[#allocation5 + $0x18] sm:$0xff]  ;;  %v47_v14 = vld [vmem:[#allocation5 + $0x10] sm:$0xff]  ;;  %v159_v42 = vsub.s32 0, %v158_v40 }
  0x1f   :  { %217 = vmatprep.subr.mxu0 %v327_v0  ;;  %v46_v15 = vld [vmem:[#allocation5 + $0x8] sm:$0xff]  ;;  %v45_v16 = vld [vmem:[#allocation5] sm:$0xff]  ;;  %v44_v17 = vld [vmem:[#allocation2] sm:$0xff] }
  0x20   :  { %218 = vmatpush3.msra.mxu0 %v58_v3  ;;  %v149_v41 = vld [vmem:[%s372_s2] sm:$0x1]  ;;  %s297_s2 = scalar_lea.vmem %s186_s30, 128 }
  0x21   :  { %219 = vmatprep.subr.mxu0 %v327_v0  ;;  %v153_v45 = vld [vmem:[%s373_s3] sm:$0x1]  ;;  %p298_p10 = scmp.ne.s32.totalorder %s186_s30, %s297_s2  ;;  %p303_p12 = scmp.lt.s32.totalorder %s297_s2, %s297_s2 }
  0x22   :  { %220 = vmatpush3.msra.mxu0 %v57_v4 }
  0x23   :  { %221 = vmatprep.subr.mxu0 %v327_v0  ;;  %p304_p13 = por %p303_p12, %p302_p11 }
  0x24   :  { %222 = vmatpush3.msra.mxu0 %v56_v5 }
  0x25   :  { %223 = vmatprep.subr.mxu0 %v327_v0  ;;  %p305_p0 = pnand %p304_p13, %p298_p10 }
  0x26   :  { %224 = vmatpush3.msra.mxu0 %v55_v6 }
  0x27   :  { %225 = vmatprep.subr.mxu0 %v327_v0 }
  0x28   :  { %226 = vmatpush3.msra.mxu0 %v54_v7 }
  0x29   :  { %227 = vmatprep.subr.mxu0 %v327_v0 }
  0x2a   :  { %228 = vmatpush3.msra.mxu0 %v53_v8 }
  0x2b   :  { %229 = vmatprep.subr.mxu0 %v327_v0 }
  0x2c   :  { %230 = vmatpush3.msra.mxu0 %v52_v9 }
  0x2d   :  { %231 = vmatprep.subr.mxu0 %v327_v0 }
  0x2e   :  { %232 = vmatpush3.msra.mxu0 %v51_v10 }
  0x2f   :  { %233 = vmatprep.subr.mxu0 %v327_v0 }
  0x30   :  { %234 = vmatpush3.msra.mxu0 %v50_v11 }
  0x31   :  { %235 = vmatprep.subr.mxu0 %v327_v0 }
  0x32   :  { %236 = vmatpush3.msra.mxu0 %v49_v12 }
  0x33   :  { %237 = vmatprep.subr.mxu0 %v327_v0 }
  0x34   :  { %238 = vmatpush3.msra.mxu0 %v48_v13 }
  0x35   :  { %239 = vmatprep.subr.mxu0 %v327_v0 }
  0x36   :  { %240 = vmatpush3.msra.mxu0 %v47_v14 }
  0x37   :  { %241 = vmatprep.subr.mxu0 %v327_v0 }
  0x38   :  { %242 = vmatpush3.msra.mxu0 %v46_v15 }
  0x39   :  { %243 = vmatprep.subr.mxu0 %v327_v0 }
  0x3a   :  { %244 = vmatpush3.msra.mxu0 %v45_v16 }
  0x3b   :  { %246 = vmatmul.mubr.f32.vlgmr.msra.gmra.mxu0 %v44_v17 }
  0xfb   :  { %v127_v18 = vpop.f32.mrf.mxu0 }
  0xfc   :  { %v131_v19 = vrot.slane %v127_v18, 4  ;;  %v137_v20 = vmul.f32 %v127_v18, %v127_v18 }
  0xfd   :  { %v247_v21 = vpop.f32.mrf.mxu0 }
  0xfe   :  { %v132_v22 = vadd.f32 %v131_v19, %v127_v18  ;;  %v138_v23 = vrot.slane %v137_v20, 4 }
 0x100   :  { %v133_v24 = vrot.slane %v132_v22, 2  ;;  %v139_v25 = vadd.f32 %v138_v23, %v137_v20 }
 0x102   :  { %v134_v26 = vadd.f32 %v133_v24, %v132_v22  ;;  %v140_v27 = vrot.slane %v139_v25, 2 }
 0x104   :  { %v135_v28 = vrot.slane %v134_v26, 1  ;;  %v141_v29 = vadd.f32 %v140_v27, %v139_v25 }
 0x106   :  { %v136_v30 = vadd.f32 %v135_v28, %v134_v26  ;;  %v142_v31 = vrot.slane %v141_v29, 1 }
 0x108   :  { %v143_v32 = vadd.f32 %v142_v31, %v141_v29  ;;  %v144_v33 = vmul.f32 0.125, %v136_v30 }
 0x10a   :  { %v145_v34 = vmul.f32 0.125, %v143_v32  ;;  %v146_v35 = vmul.f32 %v144_v33, %v144_v33 }
 0x10c   :  { %v147_v36 = vsub.f32 %v145_v34, %v146_v35 }
 0x10e   :  { %v148_v37 = vmax.f32 %v147_v36, 0.0 }
 0x110   :  { %v150_v38 = vadd.f32 1e-05, %v148_v37 }
 0x112   :  { %255 = vrsqrt.f32 %v150_v38 }
 0x11f   :  { %v256_v43 = vpop.eup %255 }
 0x120   :  { %v152_v44 = vmul.f32 %v256_v43, %v149_v41 }
 0x122   :  { %v154_v46 = vmul.f32 %v152_v44, %v144_v33  ;;  %v160_v47 = vrot.slane %v152_v44, %v159_v42 }
 0x124   :  { %v155_v48 = vsub.f32 %v153_v45, %v154_v46  ;;  %v162_v49 = vmul.f32 %v160_v47, %v127_v18 }
 0x126   :  { %v167_v50 = vrot.slane %v155_v48, %v159_v42 }
 0x128   :  { %v169_v51 = vadd.f32 %v167_v50, %v162_v49 }
 0x12a   :  { %v170_v52 = vmax.f32 %v169_v51, 0.0 }
 0x12c   :  { %v176_v53 = vadd.f32 %v170_v52, %v44_v17 }
 0x12e   :  { %v177_v54 = vmul.f32 0.70710677, %v176_v53 }
 0x130   :  { %178 = vst [vmem:[#allocation7] sm:$0xff] %v177_v54 }
 0x131   :  { %308 = shalt.err (!%p305_p0)
}
 0x132   :  { %188 = dma.vmem_to_hbm [thread:$0]  %s186_s30, 128, %s374_s4, [#allocation4]  }
 0x133   :  { %321 = dma.done.wait [#allocation4], 128  }
 0x134   :  { %322 = vsyncadd [#allocation4], 4294967168 }
 0x135   :  { %192 = vsyncpa [#allocation3], 1 }
 0x136   :  { %193 = vsyncpa [#allocation6], 1 }
 0x137   :  { %194 = vsyncpa [#allocation4], 1 }

</bundles_post_ra>
